<compile_context>
chip_gen: v7x
topology: tpu7x:2x2x1
jax: 0.10.0
libtpu: 0.0.40
codegen_flags: <defaults>
</compile_context>

<pallas_src>
import functools
import itertools

import jax
import jax.numpy as jnp
import numpy as np
from jax.experimental import pallas as pl
from jax.experimental.pallas import tpu as pltpu


def matcher_cost_kernel(logits_ref, obox_ref, onehotT_ref, tprop_ref, c_ref,
                        *, w_class, w_bbox, w_giou):
    eps = 1e-7

    # ---- softmax over classes (exact denominator; class weight folded in) ---
    logits = logits_ref[...]                                   # [TN, K] f32
    m = jnp.max(logits, axis=-1, keepdims=True)
    e = jnp.exp(logits - m)
    scale = (-w_class) / jnp.sum(e, axis=-1, keepdims=True)    # [TN, 1] exact
    probs = (e * scale).astype(jnp.bfloat16)                   # = -w_class * prob

    # ---- class cost on the MXU: [TN,K] @ [K,T_pad], f32 accumulation --------
    cost = jax.lax.dot_general(
        probs, onehotT_ref[...], (((1,), (0,)), ((), ())),
        preferred_element_type=jnp.float32)                    # [TN, T_pad]

    # ---- per-prediction (column) quantities, all [TN, 1] --------------------
    ob = obox_ref[...]                                         # [TN, 4] cxcywh
    ocx, ocy, ow, oh = ob[:, 0:1], ob[:, 1:2], ob[:, 2:3], ob[:, 3:4]
    ox0 = ocx - 0.5 * ow
    oy0 = ocy - 0.5 * oh
    ox1 = ocx + 0.5 * ow
    oy1 = ocy + 0.5 * oh
    area_o = ow * oh

    # ---- per-target (row) quantities precomputed on host, [1, T_pad] --------
    tp = tprop_ref[...]                                        # [8, T_pad]
    tcx, tcy, tw, th = tp[0:1], tp[1:2], tp[2:3], tp[3:4]
    tx0, ty0, tx1, ty1 = tp[4:5], tp[5:6], tp[6:7], tp[7:8]
    area_t = tw * th                                           # [1, T_pad]

    # ---- L1 cdist (p=1), weighted, accumulated ------------------------------
    l1 = (jnp.abs(ocx - tcx) + jnp.abs(ocy - tcy)
          + jnp.abs(ow - tw) + jnp.abs(oh - th))               # [TN, T_pad]
    cost = cost + w_bbox * l1

    # ---- generalized IoU -----------------------------------------------------
    wx = jnp.minimum(ox1, tx1) - jnp.maximum(ox0, tx0)         # intersection extents
    wy = jnp.minimum(oy1, ty1) - jnp.maximum(oy0, ty0)
    inter = jnp.maximum(wx, 0.0) * jnp.maximum(wy, 0.0)
    union = (area_o + area_t) - inter
    iou = inter * pl.reciprocal(jnp.maximum(union, eps), approx=True)

    # enclosing box via intersection extents: enclose_x = (ow + tw) - wx >= 0
    area_e = ((ow + tw) - wx) * ((oh + th) - wy)
    inv_ae = pl.reciprocal(jnp.maximum(area_e, eps), approx=True)

    # giou = iou - (area_e - union)/area_e = iou + union/area_e - 1
    # cost += -w_giou * giou  ==  + w_giou * ((1 - iou) - union/area_e)
    cost = cost + w_giou * ((1.0 - iou) - union * inv_ae)

    c_ref[...] = cost.astype(c_ref.dtype)


def _round_up(x, m):
    return ((x + m - 1) // m) * m


def compute_cost_matrix(pred_logits, pred_boxes, tgt_ids, tgt_bbox,
                        cost_class=1.0, cost_bbox=1.0, cost_giou=1.0,
                        tile_n=512):
    bs, nq, K = pred_logits.shape
    N = bs * nq
    T = int(tgt_bbox.shape[0])

    # Lane-dense output: pad T (concatenated targets) up to a multiple of 128.
    # TODO(synk): if T grows very large, add a second grid axis over T_pad to
    # bound the live [TILE_N, T_pad] intermediates (matters first on v7x).
    T_pad = max(128, _round_up(T, 128))

    # Tile N so there are >= 2-4 grid steps: pipelining on every generation and
    # a shardable "parallel" axis for v7x's two TensorCores.
    N8 = _round_up(max(N, 8), 8)
    target_steps = 4 if N8 >= 32 else max(2, N8 // 8)
    TILE_N = min(int(tile_n), max(8, _round_up(-(-N8 // target_steps), 8)))
    N_pad = _round_up(N8, TILE_N)

    logits = pred_logits.reshape(N, K).astype(jnp.float32)
    oboxes = pred_boxes.reshape(N, 4).astype(jnp.float32)
    if N_pad != N:
        logits = jnp.pad(logits, ((0, N_pad - N), (0, 0)))
        oboxes = jnp.pad(oboxes, ((0, N_pad - N), (0, 0)))

    # Host-side precompute (padded columns are never read back):
    #   one-hot^T [K, T_pad] bf16  -> RHS contracts on its major dim
    #   per-target table [8, T_pad]: cx, cy, w, h, x0, y0, x1, y1
    onehotT = jnp.pad(
        jax.nn.one_hot(tgt_ids.astype(jnp.int32), K, dtype=jnp.bfloat16),
        ((0, T_pad - T), (0, 0))).T                            # [K, T_pad]
    tb = tgt_bbox.astype(jnp.float32)
    tcx, tcy, tw, th = tb[:, 0], tb[:, 1], tb[:, 2], tb[:, 3]
    tprop = jnp.stack([tcx, tcy, tw, th,
                       tcx - 0.5 * tw, tcy - 0.5 * th,
                       tcx + 0.5 * tw, tcy + 0.5 * th], axis=0)  # [8, T]
    tprop = jnp.pad(tprop, ((0, 0), (0, T_pad - T)))             # [8, T_pad]

    # Right-size VMEM: double-buffered tiles + ~8 live f32 full-tile temporaries
    # + headroom; stay well under v7x's 64 MiB per-TC physical VMEM.
    out_tile_b = TILE_N * T_pad * 4
    in_tiles_b = TILE_N * (K + 4) * 4 + K * T_pad * 2 + 8 * T_pad * 4
    vmem_bytes = int(min(48 << 20,
                         max(16 << 20,
                             2 * (out_tile_b + in_tiles_b) + 8 * out_tile_b
                             + (4 << 20))))

    kernel = functools.partial(matcher_cost_kernel, w_class=float(cost_class),
                               w_bbox=float(cost_bbox), w_giou=float(cost_giou))

    C = pl.pallas_call(
        kernel,
        out_shape=jax.ShapeDtypeStruct((N_pad, T_pad), jnp.float32),
        grid=(N_pad // TILE_N,),
        in_specs=[
            pl.BlockSpec((TILE_N, K), lambda i: (i, 0)),     # logits tile
            pl.BlockSpec((TILE_N, 4), lambda i: (i, 0)),     # pred boxes tile
            pl.BlockSpec((K, T_pad), lambda i: (0, 0)),      # one-hot^T (resident)
            pl.BlockSpec((8, T_pad), lambda i: (0, 0)),      # target box table
        ],
        out_specs=pl.BlockSpec((TILE_N, T_pad), lambda i: (i, 0)),
        compiler_params=pltpu.CompilerParams(
            dimension_semantics=("parallel",),
            vmem_limit_bytes=vmem_bytes),
    )(logits, oboxes, onehotT, tprop)

    return C[:N, :T].reshape(bs, nq, T)


def _linear_sum_assignment_small(cost):
    """Exact minimal-cost assignment for tiny matrices (nt <= nq)."""
    # TODO(synk): linear_sum_assignment (Hungarian) is sequential host-side
    # control flow with no clean Pallas equivalent; exact brute force is used
    # here for the small demo sizes (use scipy.optimize.linear_sum_assignment
    # for DETR-scale nq).
    nq, nt = cost.shape
    best_perm, best_cost = None, None
    for perm in itertools.permutations(range(nq), nt):
        c = sum(cost[perm[j], j] for j in range(nt))
        if best_cost is None or c < best_cost:
            best_cost, best_perm = c, perm
    rows = np.asarray(best_perm, dtype=np.int64)
    cols = np.arange(nt, dtype=np.int64)
    order = np.argsort(rows)
    return rows[order], cols[order]


def hungarian_matcher(pred_logits, pred_boxes, targets,
                      cost_class=1.0, cost_bbox=1.0, cost_giou=1.0):
    """Mirrors HungarianMatcher.forward."""
    tgt_ids = jnp.concatenate([t["labels"] for t in targets])
    tgt_bbox = jnp.concatenate([t["boxes"] for t in targets])
    C = compute_cost_matrix(pred_logits, pred_boxes, tgt_ids, tgt_bbox,
                            cost_class, cost_bbox, cost_giou)
    C = jax.block_until_ready(C)
    C_np = np.asarray(C)                               # [bs, nq, sum(Ti)]
    sizes = [int(t["boxes"].shape[0]) for t in targets]
    indices, off = [], 0
    for i, s in enumerate(sizes):
        c_i = C_np[i, :, off:off + s]                  # unpadded column coords
        indices.append(_linear_sum_assignment_small(c_i))
        off += s
    return indices


if __name__ == "__main__":
    key = jax.random.PRNGKey(0)
    bs, nq, num_classes = 2, 8, 16
    sizes = [3, 5]

    k1, k2, k3, k4 = jax.random.split(key, 4)
    pred_logits = jax.random.normal(k1, (bs, nq, num_classes), jnp.float32)
    pred_boxes = jax.nn.sigmoid(jax.random.normal(k2, (bs, nq, 4), jnp.float32))

    targets = []
    for i, s in enumerate(sizes):
        labels = jax.random.randint(jax.random.fold_in(k3, i), (s,), 0, num_classes)
        boxes = jax.nn.sigmoid(jax.random.normal(jax.random.fold_in(k4, i), (s, 4),
                                                 jnp.float32))
        targets.append({"labels": labels, "boxes": boxes})

    indices = hungarian_matcher(pred_logits, pred_boxes, targets,
                                cost_class=1.0, cost_bbox=1.0, cost_giou=1.0)

    # sanity: one (row, col) index pair per image, sizes match min(nq, Ti)
    assert len(indices) == bs
    for (ri, ci), s in zip(indices, sizes):
        assert ri.dtype == np.int64 and ci.dtype == np.int64
        assert len(ri) == len(ci) == min(nq, s)
        assert len(np.unique(ri)) == len(ri)

    print("KERNEL_OK")
</pallas_src>

<mosaic_0001>
module attributes {stable_mosaic.version = 11 : i64} {
  func.func @matcher_cost_kernel(%arg0: i32, %arg1: memref<8x16xf32, #tpu.memory_space<vmem>>, %arg2: memref<8x4xf32, #tpu.memory_space<vmem>>, %arg3: memref<16x128xbf16, #tpu.memory_space<vmem>>, %arg4: memref<8x128xf32, #tpu.memory_space<vmem>>, %arg5: memref<8x128xf32, #tpu.memory_space<vmem>>) attributes {dimension_semantics = [#tpu.dimension_semantics<parallel>], iteration_bounds = array<i64: 2>, scalar_prefetch = 0 : i64, scratch_operands = 0 : i64, tpu.core_type = #tpu.core_type<tc>, window_params = [{transform_indices = @transform_0, window_bounds = array<i64: 8, 16>}, {transform_indices = @transform_1, window_bounds = array<i64: 8, 4>}, {pipeline_mode = #tpu.pipeline_mode<synchronous>, transform_indices = @transform_2, window_bounds = array<i64: 16, 128>}, {pipeline_mode = #tpu.pipeline_mode<synchronous>, transform_indices = @transform_3, window_bounds = array<i64: 8, 128>}, {transform_indices = @transform_4, window_bounds = array<i64: 8, 128>}]} {
    %c0 = arith.constant 0 : index
    %c0_0 = arith.constant 0 : index
    %0 = vector.load %arg1[%c0, %c0_0] : memref<8x16xf32, #tpu.memory_space<vmem>>, vector<8x16xf32>
    %cst = arith.constant dense<0xFF800000> : vector<8xf32>
    %1 = vector.multi_reduction <maximumf>, %0, %cst [1] : vector<8x16xf32> to vector<8xf32>
    %2 = vector.shape_cast %1 : vector<8xf32> to vector<8x1xf32>
    %3 = vector.broadcast %2 : vector<8x1xf32> to vector<8x16xf32>
    %4 = arith.subf %0, %3 : vector<8x16xf32>
    %5 = math.exp %4 : vector<8x16xf32>
    %cst_1 = arith.constant dense<0.000000e+00> : vector<8xf32>
    %6 = vector.multi_reduction <add>, %5, %cst_1 [1] : vector<8x16xf32> to vector<8xf32>
    %7 = vector.shape_cast %6 : vector<8xf32> to vector<8x1xf32>
    %cst_2 = arith.constant -1.000000e+00 : f32
    %8 = vector.broadcast %cst_2 : f32 to vector<8x1xf32>
    %9 = arith.divf %8, %7 : vector<8x1xf32>
    %10 = vector.broadcast %9 : vector<8x1xf32> to vector<8x16xf32>
    %11 = arith.mulf %5, %10 : vector<8x16xf32>
    %12 = arith.truncf %11 : vector<8x16xf32> to vector<8x16xbf16>
    %c0_3 = arith.constant 0 : index
    %c0_4 = arith.constant 0 : index
    %13 = vector.load %arg3[%c0_3, %c0_4] : memref<16x128xbf16, #tpu.memory_space<vmem>>, vector<16x128xbf16>
    %cst_5 = arith.constant dense<0.000000e+00> : vector<8x128xf32>
    %14 = tpu.matmul %12, %13, %cst_5 {dimension_numbers = #tpu.dot_dimension_numbers<[1], [0], [0], [1], [0, 0, 1, 1], [], []>} : vector<8x16xbf16>, vector<16x128xbf16>, vector<8x128xf32> -> vector<8x128xf32>
    %c0_6 = arith.constant 0 : index
    %c0_7 = arith.constant 0 : index
    %15 = vector.load %arg2[%c0_6, %c0_7] : memref<8x4xf32, #tpu.memory_space<vmem>>, vector<8x4xf32>
    %16 = vector.extract_strided_slice %15 {offsets = [0, 0], sizes = [8, 1], strides = [1, 1]} : vector<8x4xf32> to vector<8x1xf32>
    %17 = vector.extract_strided_slice %15 {offsets = [0, 1], sizes = [8, 1], strides = [1, 1]} : vector<8x4xf32> to vector<8x1xf32>
    %18 = vector.extract_strided_slice %15 {offsets = [0, 2], sizes = [8, 1], strides = [1, 1]} : vector<8x4xf32> to vector<8x1xf32>
    %19 = vector.extract_strided_slice %15 {offsets = [0, 3], sizes = [8, 1], strides = [1, 1]} : vector<8x4xf32> to vector<8x1xf32>
    %cst_8 = arith.constant 5.000000e-01 : f32
    %20 = vector.broadcast %cst_8 : f32 to vector<8x1xf32>
    %21 = arith.mulf %20, %18 : vector<8x1xf32>
    %22 = arith.subf %16, %21 : vector<8x1xf32>
    %cst_9 = arith.constant 5.000000e-01 : f32
    %23 = vector.broadcast %cst_9 : f32 to vector<8x1xf32>
    %24 = arith.mulf %23, %19 : vector<8x1xf32>
    %25 = arith.subf %17, %24 : vector<8x1xf32>
    %cst_10 = arith.constant 5.000000e-01 : f32
    %26 = vector.broadcast %cst_10 : f32 to vector<8x1xf32>
    %27 = arith.mulf %26, %18 : vector<8x1xf32>
    %28 = arith.addf %16, %27 : vector<8x1xf32>
    %cst_11 = arith.constant 5.000000e-01 : f32
    %29 = vector.broadcast %cst_11 : f32 to vector<8x1xf32>
    %30 = arith.mulf %29, %19 : vector<8x1xf32>
    %31 = arith.addf %17, %30 : vector<8x1xf32>
    %32 = arith.mulf %18, %19 : vector<8x1xf32>
    %c0_12 = arith.constant 0 : index
    %c0_13 = arith.constant 0 : index
    %33 = vector.load %arg4[%c0_12, %c0_13] : memref<8x128xf32, #tpu.memory_space<vmem>>, vector<8x128xf32>
    %34 = vector.extract_strided_slice %33 {offsets = [0, 0], sizes = [1, 128], strides = [1, 1]} : vector<8x128xf32> to vector<1x128xf32>
    %35 = vector.extract_strided_slice %33 {offsets = [1, 0], sizes = [1, 128], strides = [1, 1]} : vector<8x128xf32> to vector<1x128xf32>
    %36 = vector.extract_strided_slice %33 {offsets = [2, 0], sizes = [1, 128], strides = [1, 1]} : vector<8x128xf32> to vector<1x128xf32>
    %37 = vector.extract_strided_slice %33 {offsets = [3, 0], sizes = [1, 128], strides = [1, 1]} : vector<8x128xf32> to vector<1x128xf32>
    %38 = vector.extract_strided_slice %33 {offsets = [4, 0], sizes = [1, 128], strides = [1, 1]} : vector<8x128xf32> to vector<1x128xf32>
    %39 = vector.extract_strided_slice %33 {offsets = [5, 0], sizes = [1, 128], strides = [1, 1]} : vector<8x128xf32> to vector<1x128xf32>
    %40 = vector.extract_strided_slice %33 {offsets = [6, 0], sizes = [1, 128], strides = [1, 1]} : vector<8x128xf32> to vector<1x128xf32>
    %41 = vector.extract_strided_slice %33 {offsets = [7, 0], sizes = [1, 128], strides = [1, 1]} : vector<8x128xf32> to vector<1x128xf32>
    %42 = arith.mulf %36, %37 : vector<1x128xf32>
    %43 = vector.broadcast %16 : vector<8x1xf32> to vector<8x128xf32>
    %44 = vector.broadcast %34 : vector<1x128xf32> to vector<8x128xf32>
    %45 = arith.subf %43, %44 : vector<8x128xf32>
    %46 = math.absf %45 : vector<8x128xf32>
    %47 = vector.broadcast %17 : vector<8x1xf32> to vector<8x128xf32>
    %48 = vector.broadcast %35 : vector<1x128xf32> to vector<8x128xf32>
    %49 = arith.subf %47, %48 : vector<8x128xf32>
    %50 = math.absf %49 : vector<8x128xf32>
    %51 = arith.addf %46, %50 : vector<8x128xf32>
    %52 = vector.broadcast %18 : vector<8x1xf32> to vector<8x128xf32>
    %53 = vector.broadcast %36 : vector<1x128xf32> to vector<8x128xf32>
    %54 = arith.subf %52, %53 : vector<8x128xf32>
    %55 = math.absf %54 : vector<8x128xf32>
    %56 = arith.addf %51, %55 : vector<8x128xf32>
    %57 = vector.broadcast %19 : vector<8x1xf32> to vector<8x128xf32>
    %58 = vector.broadcast %37 : vector<1x128xf32> to vector<8x128xf32>
    %59 = arith.subf %57, %58 : vector<8x128xf32>
    %60 = math.absf %59 : vector<8x128xf32>
    %61 = arith.addf %56, %60 : vector<8x128xf32>
    %cst_14 = arith.constant 1.000000e+00 : f32
    %62 = vector.broadcast %cst_14 : f32 to vector<8x128xf32>
    %63 = arith.mulf %62, %61 : vector<8x128xf32>
    %64 = arith.addf %14, %63 : vector<8x128xf32>
    %65 = vector.broadcast %28 : vector<8x1xf32> to vector<8x128xf32>
    %66 = vector.broadcast %40 : vector<1x128xf32> to vector<8x128xf32>
    %67 = arith.minimumf %65, %66 : vector<8x128xf32>
    %68 = vector.broadcast %22 : vector<8x1xf32> to vector<8x128xf32>
    %69 = vector.broadcast %38 : vector<1x128xf32> to vector<8x128xf32>
    %70 = arith.maximumf %68, %69 : vector<8x128xf32>
    %71 = arith.subf %67, %70 : vector<8x128xf32>
    %72 = vector.broadcast %31 : vector<8x1xf32> to vector<8x128xf32>
    %73 = vector.broadcast %41 : vector<1x128xf32> to vector<8x128xf32>
    %74 = arith.minimumf %72, %73 : vector<8x128xf32>
    %75 = vector.broadcast %25 : vector<8x1xf32> to vector<8x128xf32>
    %76 = vector.broadcast %39 : vector<1x128xf32> to vector<8x128xf32>
    %77 = arith.maximumf %75, %76 : vector<8x128xf32>
    %78 = arith.subf %74, %77 : vector<8x128xf32>
    %cst_15 = arith.constant 0.000000e+00 : f32
    %79 = vector.broadcast %cst_15 : f32 to vector<8x128xf32>
    %80 = arith.maximumf %71, %79 : vector<8x128xf32>
    %cst_16 = arith.constant 0.000000e+00 : f32
    %81 = vector.broadcast %cst_16 : f32 to vector<8x128xf32>
    %82 = arith.maximumf %78, %81 : vector<8x128xf32>
    %83 = arith.mulf %80, %82 : vector<8x128xf32>
    %84 = vector.broadcast %32 : vector<8x1xf32> to vector<8x128xf32>
    %85 = vector.broadcast %42 : vector<1x128xf32> to vector<8x128xf32>
    %86 = arith.addf %84, %85 : vector<8x128xf32>
    %87 = arith.subf %86, %83 : vector<8x128xf32>
    %cst_17 = arith.constant 1.000000e-07 : f32
    %88 = vector.broadcast %cst_17 : f32 to vector<8x128xf32>
    %89 = arith.maximumf %87, %88 : vector<8x128xf32>
    %90 = tpu.reciprocal %89 {approx = true} : vector<8x128xf32> -> vector<8x128xf32>
    %91 = arith.mulf %83, %90 : vector<8x128xf32>
    %92 = vector.broadcast %18 : vector<8x1xf32> to vector<8x128xf32>
    %93 = vector.broadcast %36 : vector<1x128xf32> to vector<8x128xf32>
    %94 = arith.addf %92, %93 : vector<8x128xf32>
    %95 = arith.subf %94, %71 : vector<8x128xf32>
    %96 = vector.broadcast %19 : vector<8x1xf32> to vector<8x128xf32>
    %97 = vector.broadcast %37 : vector<1x128xf32> to vector<8x128xf32>
    %98 = arith.addf %96, %97 : vector<8x128xf32>
    %99 = arith.subf %98, %78 : vector<8x128xf32>
    %100 = arith.mulf %95, %99 : vector<8x128xf32>
    %cst_18 = arith.constant 1.000000e-07 : f32
    %101 = vector.broadcast %cst_18 : f32 to vector<8x128xf32>
    %102 = arith.maximumf %100, %101 : vector<8x128xf32>
    %103 = tpu.reciprocal %102 {approx = true} : vector<8x128xf32> -> vector<8x128xf32>
    %cst_19 = arith.constant 1.000000e+00 : f32
    %104 = vector.broadcast %cst_19 : f32 to vector<8x128xf32>
    %105 = arith.subf %104, %91 : vector<8x128xf32>
    %106 = arith.mulf %87, %103 : vector<8x128xf32>
    %107 = arith.subf %105, %106 : vector<8x128xf32>
    %cst_20 = arith.constant 1.000000e+00 : f32
    %108 = vector.broadcast %cst_20 : f32 to vector<8x128xf32>
    %109 = arith.mulf %108, %107 : vector<8x128xf32>
    %110 = arith.addf %64, %109 : vector<8x128xf32>
    %c0_21 = arith.constant 0 : index
    %c0_22 = arith.constant 0 : index
    %111 = vector.load %arg5[%c0_21, %c0_22] : memref<8x128xf32, #tpu.memory_space<vmem>>, vector<8x128xf32>
    tpu.vector_store %arg5[%c0_21, %c0_22], %110 {strides = array<i32>} : memref<8x128xf32, #tpu.memory_space<vmem>>, vector<8x128xf32>,
    return
  }
  func.func @transform_0(%arg0: i32) -> (i32, i32) {
    %c0_i32 = arith.constant 0 : i32
    %c0_i32_0 = arith.constant 0 : i32
    return %arg0, %c0_i32 : i32, i32
  }
  func.func @transform_1(%arg0: i32) -> (i32, i32) {
    %c0_i32 = arith.constant 0 : i32
    %c0_i32_0 = arith.constant 0 : i32
    return %arg0, %c0_i32 : i32, i32
  }
  func.func @transform_2(%arg0: i32) -> (i32, i32) {
    %c0_i32 = arith.constant 0 : i32
    %c0_i32_0 = arith.constant 0 : i32
    %c0_i32_1 = arith.constant 0 : i32
    return %c0_i32, %c0_i32_0 : i32, i32
  }
  func.func @transform_3(%arg0: i32) -> (i32, i32) {
    %c0_i32 = arith.constant 0 : i32
    %c0_i32_0 = arith.constant 0 : i32
    %c0_i32_1 = arith.constant 0 : i32
    return %c0_i32, %c0_i32_0 : i32, i32
  }
  func.func @transform_4(%arg0: i32) -> (i32, i32) {
    %c0_i32 = arith.constant 0 : i32
    %c0_i32_0 = arith.constant 0 : i32
    return %arg0, %c0_i32 : i32, i32
  }
}

</mosaic_0001>

<bundles_post_ra>
// kernel: tpu_custom_call.1
= control target key start
LH: loop header
LB: loop body
LE: loop exit
PB: predicated region body
PF: predicated region fallthrough
CT: control target
= control target key end

     0   :  { %9 = vsyncpa [#allocation3], 0  ;;  %s891_s0 = inlined_call_operand.vmem [shape: f32[16,16], index: 0, kind: input, shape index: {}]   ;;  %s892_s1 = inlined_call_operand.vmem [shape: f32[16,4], index: 1, kind: input, shape index: {}]   ;;  %s893_s2 = inlined_call_operand.vmem [shape: bf16[16,128], index: 2, kind: input, shape index: {}]   ;;  %s894_s3 = inlined_call_operand.hbm [shape: f32[8,128], index: 3, kind: input, shape index: {}]   ;;  %s895_s4 = inlined_call_operand.hbm [shape: f32[16,128], index: 4, kind: output, shape index: {}]  }
   0x1   :  { %10 = vsyncpa [#allocation4], 0 }
   0x2   :  { %12 = vsyncpa [#allocation4 + $0x1], 0  ;;  %s747_s15 = smov 0   ;;  %s749_s16 = smov 0  }
   0x3   :  { %s751_s17 = smov 0   ;;  %s753_s18 = smov 0  }
   0x4 LB: > { %s768_s19 = sadd.s32 4294967295, %s710_s18   ;;  %s517_s20 = sadd.s32 4294967294, %s710_s18   ;;  %s710_s18 = sphi %s753_s18, %s911_s18   ;;  %s706_s17 = sphi %s751_s17, %s910_s17   ;;  %s702_s16 = sphi %s749_s16, %s909_s16   ;;  %s698_s15 = sphi %s747_s15, %s908_s15  }
   0x5   : > { %s772_s21 = sadd.s32 1, %s710_s18   ;;  %s119_s22 = sadd.s32 1, %s706_s17 }
   0x6   : > { %s116_s23 = ssub.s32 %s710_s18, %s772_s21  ;;  %p129_p0 = scmp.ne.s32.totalorder %s706_s17, %s702_s16 }
   0x7   : > { %p117_p1 = scmp.eq.s32.totalorder %s116_s23, 0  ;;  %p130_p2 = scmp.eq.s32.totalorder %s768_s19, 1 }
   0x8   : > { %p135_p3 = scmp.ne.s32.totalorder %s702_s16, %s698_s15  ;;  %p136_p4 = scmp.eq.s32.totalorder %s517_s20, 1 }
   0x9   : > { %s783_s24 = scalar_select %p117_p1, %s706_s17, %s119_s22  }
   0xa   : > { %p785_p5 = por %p130_p2, %p129_p0  ;;  %p789_p6 = por %p136_p4, %p135_p3 }
   0xb   : > { %p518_p7 = scmp.ge.s32.totalorder %s710_s18, 1  ;;  %p143_p8 = scmp.lt.s32.totalorder %s710_s18, 3 }
   0xc   : > { %s899_s25 = scalar_select %p785_p5, 1, 0 }
   0xd   : > { %s900_s26 = scalar_select %p789_p6, 1, 0 }
   0xe   : > { %p896_p9 = scmp.eq.s32.totalorder %s768_s19, 0  ;;  %p796_p10 = pnand %p518_p7, %p143_p8 }
   0xf   : > { %s712_s28 = smov [#allocation2]   ;;  %s616_s7 = scalar_lea.hbm %s894_s3, 128 }
  0x10   : > { %s901_s27 = scalar_select %p796_p10, 1, 0 }
  0x11   : > { %s159_s29 = sshll.u32 %s712_s28, 4  ;;  %p546_p11 = pneg %p796_p10  ;;  %s160_s29 = int_to_ptr.vmem [resolvable:$true] %s159_s29 }
  0x12   : > { %p617_p13 = scmp.ne.s32.totalorder %s894_s3, %s616_s7  ;;  %p623_p3 = scmp.lt.u32.totalorder %s616_s7, %s894_s3 }
  0x13   : > { %p804_p12 = pnand %p896_p9, %p546_p11 }
  0x15   : > { %p618_p0 = pneg %p804_p12 }
  0x17   : > { %p619_p1 = pnand %p618_p0, %p617_p13 }
  0x19   : > { %p620_p2 = pneg %p619_p1 }
  0x1b   : > { %p625_p4 = pnand %p623_p3, %p620_p2 }
  0x1d   : > { %628 = shalt.err (!%p625_p4)
}
  0x1e   : > { %s629_s12 = scalar_lea.vmem %s160_s29, 128  ;;  %p637_p9 = scmp.lt.s32.totalorder %s160_s29, %s160_s29 }
  0x1f   : > { %p630_p7 = scmp.ne.s32.totalorder %s160_s29, %s629_s12  ;;  %p638_p6 = scmp.lt.s32.totalorder %s629_s12, %s629_s12 }
  0x21   : > { %p632_p8 = pnand %p630_p7, %p618_p0  ;;  %p639_p5 = por %p638_p6, %p637_p9 }
  0x23   : > { %p633_p11 = pneg %p632_p8 }
  0x25   : > { %p640_p10 = pnand %p639_p5, %p633_p11 }
  0x27   : > { %643 = shalt.err (!%p640_p10)
}
  0x28   : > { %549 = dma.hbm_to_vmem [thread:$0]  (!%p804_p12), %s894_s3, 128, %s160_s29, [#allocation3]  }
  0x29   : > { %p903_p13 = scmp.ne.s32.totalorder %s901_s27, 0 }
  0x2a   : > { %p904_p1 = scmp.eq.s32.totalorder (!%p903_p13), %s768_s19, 0 }
  0x2b   : > { %186 = sbr.rel (%p903_p13) target bundleno = 606 (0x25e), region = 36 }
  0x32   : > { %689 = dma.done.wait (%p904_p1), [#allocation3], 128   ;;  %p905_p0 = pmov %p904_p1 }
  0x33   : > { %p215_p6 = scmp.lt.s32.totalorder %s768_s19, 1  ;;  %vm225_vm0 = vcmask 130048   ;;  %s713_s6 = smov 126   ;;  %v607_v9 = vld [vmem:[%s893_s2] sm:$0xff]   ;;  %v715_v10 = vmov 0.0   ;;  %vm716_vm1 = vmmov 0   ;;  %v263_v26 = vlaneseq }
  0x34   : > { %691 = vsyncadd (%p905_p0), [#allocation3], 4294967168  ;;  %s714_s7 = smov 127   ;;  %534 = vmatprep.subr.bf16.mxu0 %v715_v10  ;;  %536 = vmatprep.mubr.msk.bf16.mxu0 %vm716_vm1, %v715_v10  ;;  %v717_v14 = vmov 0   ;;  %v718_v15 = vmov 1   ;;  %v719_v16 = vmov 2  }
  0x35   : > { %s216_s20 = scalar_select %p215_p6, %s768_s19, 1  ;;  %535 = vmatpush3.bf16.msra.mxu0 %v607_v9  ;;  %599 = vset.pattern.permute.xlu1 %v717_v14  ;;  %v720_v18 = vmov 3   ;;  %v264_v28 = vshrl.u32 %v263_v26, 7  ;;  %v254_v34 = vld [vmem:[#allocation2] sm:$0xff] }
  0x36   : > { %598 = vset.pattern.permute.xlu0 %v717_v14  ;;  %v256_v41 = vrot.slane %v254_v34, 1  ;;  %s212_s10 = sand.u32 1, %s702_s16   ;;  %s529_s12 = sshll.u32 %s768_s19, 7 }
  0x37   : > { %s524_s22 = sshll.u32 %s216_s20, 3  ;;  %v368_v30 = vsub.s32 4, %v264_v28  ;;  %v378_v31 = vsub.s32 7, %v264_v28  ;;  %v387_v32 = vsub.s32 5, %v264_v28  ;;  %v358_v33 = vsub.s32 6, %v264_v28  ;;  %s523_s11 = sshll.u32 %s212_s10, 3 }
  0x38   : > { %s218_s30 = scalar_lea.vmem %s891_s0, %s524_s22  ;;  %s222_s5 = scalar_lea.vmem %s892_s1, %s524_s22  ;;  %v286_v46 = vsub.s32 2, %v264_v28  ;;  %v297_v50 = vsub.s32 3, %v264_v28  ;;  %v258_v51 = vmul.f32 %v256_v41, %v254_v34 }
  0x39   : > { %v224_v0 = vld [vmem:[%s218_s30] sm:$0xff]  ;;  %v369_v35 = vrot.slane %v254_v34, %v368_v30  ;;  %v379_v36 = vrot.slane %v254_v34, %v378_v31  ;;  %v388_v37 = vrot.slane %v254_v34, %v387_v32  ;;  %v359_v38 = vrot.slane %v254_v34, %v358_v33  ;;  %s214_s13 = scalar_lea.vmem [#allocation5], %s523_s11  ;;  %s849_s23 = scalar_lea.hbm %s895_s4, %s529_s12 }
  0x3a   : > { %v226_v1 = vsel %vm225_vm0, %v224_v0, -inf  ;;  %v241_v2 = vld [vmem:[%s222_s5] sm:$0xff]  ;;  %v287_v52 = vrot.slane %v254_v34, %v286_v46  ;;  %v298_v55 = vrot.slane %v254_v34, %v297_v50  ;;  %v402_v56 = vrot.slane %v258_v51, %v286_v46  ;;  %s434_s14 = sshll.u32 %s214_s13, 4  ;;  %s421_s19 = scalar_lea.sflag [#allocation4], %s212_s10  ;;  %s851_s14 = int_to_ptr.vmem [resolvable:$true] %s434_s14 }
  0x3b   : > { %227 = vmax.xlane.f32.xlu0 %v226_v1  ;;  %v242_v3 = vmul.f32 0.5, %v241_v2  ;;  %s644_s28 = scalar_lea.vmem %s851_s14, 128  ;;  %p906_p9 = scmp.ne.s32.totalorder %s899_s25, 0 }
  0x3c   : > { %p645_p5 = scmp.ne.s32.totalorder %s851_s14, %s644_s28  ;;  %s721_s30 = smov [#allocation5]  }
  0x3d   : > { %244 = vrot.lane.b32.xlu1 %v242_v3, %s713_s6  ;;  %v275_v3 = vsub.s32 1, %v264_v28  ;;  %s648_s27 = sshll.u32 %s721_s30, 4  ;;  %s649_s27 = int_to_ptr.vmem [resolvable:$false] %s648_s27 }
  0x3e   : > { %p646_p10 = pnand %p645_p5, %p906_p9  ;;  %s650_s29 = scalar_lea.vmem %s649_s27, 256 }
  0x3f   : > { %p651_p2 = scmp.lt.s32.totalorder %s851_s14, %s649_s27  ;;  %p652_p3 = scmp.lt.s32.totalorder %s650_s29, %s644_s28 }
  0x40   : > { %p647_p12 = pneg %p646_p10 }
  0x41   : > { %250 = vrot.lane.b32.xlu1 %v241_v2, %s714_s7  ;;  %p653_p4 = por %p652_p3, %p651_p2 }
  0x43   : > { %p654_p7 = pnand %p653_p4, %p647_p12 }
  0xaf   : > { %v245_v11 = vpop.permute.xlu1 %244 }
  0xb0   : > { %v247_v12 = vsub.f32 %v241_v2, %v245_v11  ;;  %v248_v13 = vadd.f32 %v245_v11, %v241_v2 }
  0xb2   : > { %363 = vperm.xlu1 %599, %v247_v12  }
  0xb3   : > { %v251_v17 = vpop.permute.xlu1 %250 }
  0xb4   : > { %v253_v19 = vmul.f32 %v251_v17, %v241_v2 }
  0xb6   : > { %600 = vset.pattern.permute.xlu1 %v718_v15 }
  0xb7   : > { %373 = vperm.xlu1 %600, %v248_v13  }
  0xbb   : > { %382 = vperm.xlu1 %600, %v247_v12  }
  0xbf   : > { %601 = vset.pattern.permute.xlu1 %v719_v16 }
  0xc0   : > { %281 = vperm.xlu1 %601, %v241_v2  }
  0xc4   : > { %602 = vset.pattern.permute.xlu1 %v720_v18 }
  0xc5   : > { %292 = vperm.xlu1 %602, %v241_v2  }
  0xc8   : > { %v228_v4 = vpop.xlane.xlu0 %227 }
  0xc9   : > { %v229_v5 = vsub.f32 %v224_v0, %v228_v4  ;;  %603 = vset.pattern.permute.xlu1 %v719_v16 }
  0xca   : > { %396 = vperm.xlu1 %603, %v253_v19  }
  0xcb   : > { %v230_v6 = vmul.f32 1.442695, %v229_v5 }
  0xcd   : > { %608 = vpow2.f32 %v230_v6 }
  0xce   : > { %604 = vset.pattern.permute.xlu1 %v717_v14 }
  0xcf   : > { %260 = vperm.xlu1 %604, %v241_v2  }
  0xd3   : > { %605 = vset.pattern.permute.xlu1 %v718_v15 }
  0xd4   : > { %270 = vperm.xlu1 %605, %v241_v2   ;;  %v265_v2 = vsub.s32 0, %v264_v28 }
  0xd6   : > { %v266_v6 = vrot.slane %v254_v34, %v265_v2 }
  0xd7   : > { %v609_v7 = vpop.eup %608 }
  0xd8   : > { %v232_v8 = vsel %vm225_vm0, %v609_v7, 0.0 }
  0xd9   : > { %233 = vadd.xlane.f32.xlu0 %v232_v8 }
  0xef   : > { %353 = vperm.xlu0 %598, %v248_v13  }
  0xf3   : > { %606 = vset.pattern.permute.xlu0 %v719_v16 }
 0x131   : > { %v364_v25 = vpop.permute.xlu1 %363 }
 0x132   : > { %v370_v42 = vmax.f32 %v364_v25, %v369_v35 }
 0x136   : > { %v374_v27 = vpop.permute.xlu1 %373 }
 0x137   : > { %v380_v43 = vmin.f32 %v374_v27, %v379_v36 }
 0x13a   : > { %v383_v29 = vpop.permute.xlu1 %382 }
 0x13b   : > { %v389_v44 = vmax.f32 %v383_v29, %v388_v37 }
 0x13d   : > { %v390_v48 = vsub.f32 %v380_v43, %v389_v44 }
 0x13f   : > { %v282_v39 = vpop.permute.xlu1 %281  ;;  %v392_v53 = vmax.f32 %v390_v48, 0.0 }
 0x140   : > { %v408_v58 = vadd.f32 %v287_v52, %v282_v39  ;;  %v288_v12 = vsub.f32 %v282_v39, %v287_v52 }
 0x142   : > { %v289_v16 = vand.u32 2147483647, %v288_v12 }
 0x144   : > { %v293_v47 = vpop.permute.xlu1 %292 }
 0x145   : > { %v410_v59 = vadd.f32 %v298_v55, %v293_v47  ;;  %v299_v17 = vsub.f32 %v293_v47, %v298_v55 }
 0x147   : > { %v411_v63 = vsub.f32 %v410_v59, %v390_v48 }
 0x149   : > { %v397_v57 = vpop.permute.xlu1 %396 }
 0x14a   : > { %v403_v61 = vadd.f32 %v402_v56, %v397_v57 }
 0x14e   : > { %v261_v1 = vpop.permute.xlu1 %260 }
 0x14f   : > { %v267_v10 = vsub.f32 %v261_v1, %v266_v6 }
 0x151   : > { %v268_v13 = vand.u32 2147483647, %v267_v10 }
 0x153   : > { %v271_v9 = vpop.permute.xlu1 %270 }
 0x166   : > { %v234_v20 = vpop.xlane.xlu0 %233 }
 0x167   : > { %610 = vrcp.f32 %v234_v20 }
 0x16e   : > { %v354_v40 = vpop.permute.xlu0 %353 }
 0x16f   : > { %v360_v45 = vmin.f32 %v354_v40, %v359_v38 }
 0x171   : > { %v611_v21 = vpop.eup %610  ;;  %v371_v49 = vsub.f32 %v360_v45, %v370_v42 }
 0x172   : > { %v236_v22 = vmul.f32 -1.0, %v611_v21  ;;  %v300_v21 = vand.u32 2147483647, %v299_v17 }
 0x173   : > { %v391_v54 = vmax.f32 %v371_v49, 0.0  ;;  %v409_v62 = vsub.f32 %v408_v58, %v371_v49 }
 0x174   : > { %v237_v23 = vmul.f32 %v609_v7, %v236_v22  ;;  %v276_v7 = vrot.slane %v254_v34, %v275_v3 }
 0x175   : > { %v393_v60 = vmul.f32 %v392_v53, %v391_v54  ;;  %v412_v4 = vmul.f32 %v411_v63, %v409_v62 }
 0x176   : > { %v238_v24 = vpack.c.bf16 %v237_v23, %v237_v23  ;;  %v277_v11 = vsub.f32 %v271_v9, %v276_v7 }
 0x177   : > { %v404_v0 = vsub.f32 %v403_v61, %v393_v60  ;;  %v413_v8 = vmax.f32 %v412_v4, 1e-07 }
 0x178   : > { %537 = vmatmul.mubr.msk.bf16.vlgmr.msra.gmra.mrb[0].mxu0 %vm225_vm0, %v238_v24  ;;  %v278_v14 = vand.u32 2147483647, %v277_v11 }
 0x179   : > { %v405_v5 = vmax.f32 %v404_v0, 1e-07 }
 0x17a   : > { %v279_v18 = vadd.f32 %v278_v14, %v268_v13 }
 0x17b   : > { %612 = vrcp.f32 %v405_v5 }
 0x17c   : > { %614 = vrcp.f32 %v413_v8  ;;  %v290_v22 = vadd.f32 %v289_v16, %v279_v18 }
 0x17e   : > { %v301_v25 = vadd.f32 %v300_v21, %v290_v22 }
 0x185   : > { %v613_v15 = vpop.eup %612 }
 0x186   : > { %v407_v19 = vmul.f32 %v613_v15, %v393_v60  ;;  %v615_v20 = vpop.eup %614 }
 0x187   : > { %v416_v23 = vmul.f32 %v615_v20, %v404_v0 }
 0x188   : > { %v415_v24 = vsub.f32 1.0, %v407_v19 }
 0x18a   : > { %v417_v28 = vsub.f32 %v415_v24, %v416_v23 }
 0x24b   : > { %v345_v26 = vpop.f32.mrb[0].mxu0 }
 0x24c   : > { %v346_v27 = vadd.f32 %v345_v26, %v301_v25  ;;  %v538_v29 = vpop.f32.mrb[1].mxu0 }
 0x24d   : > { %v348_v30 = vpop.f32.mrb[2].mxu0 }
 0x24e   : > { %v418_v31 = vadd.f32 %v417_v28, %v346_v27  ;;  %v539_v32 = vpop.f32.mrb[3].mxu0 }
 0x250   : > { %419 = vst [vmem:[%s214_s13] sm:$0xff] %v418_v31 }
 0x251   : > { %657 = shalt.err (!%p654_p7)
}
 0x252   : > { %s658_s5 = scalar_lea.hbm %s849_s23, 128  ;;  %s662_s8 = scalar_lea.hbm %s895_s4, 256 }
 0x253   : > { %p659_p8 = scmp.ne.s32.totalorder %s849_s23, %s658_s5  ;;  %p663_p1 = scmp.lt.u32.totalorder %s849_s23, %s895_s4 }
 0x254   : > { %p664_p0 = scmp.lt.u32.totalorder %s662_s8, %s658_s5  ;;  %p666_p5 = scmp.lt.u32.totalorder %s658_s5, %s849_s23 }
 0x255   : > { %p660_p11 = pnand %p659_p8, %p906_p9 }
 0x256   : > { %p665_p6 = por %p664_p0, %p663_p1 }
 0x257   : > { %p661_p13 = pneg %p660_p11 }
 0x258   : > { %p667_p10 = por %p666_p5, %p665_p6 }
 0x25a   : > { %p668_p12 = pnand %p667_p10, %p661_p13 }
 0x25c   : > { %671 = shalt.err (!%p668_p12)
}
 0x25d   : > { %544 = dma.vmem_to_hbm [thread:$0]  (%p906_p9), %s851_s14, 128, %s849_s23, %s421_s19  }
 0x25e PF: > { %p556_p2 = scmp.ge.s32.totalorder %s710_s18, 2  ;;  %s446_s11 = sand.u32 1, %s698_s15  }
 0x25f   : > { %p907_p3 = scmp.ne.s32.totalorder %s900_s26, 0  ;;  %s447_s12 = scalar_lea.sflag [#allocation4], %s446_s11 }
 0x261   : > { %p551_p4 = pnand %p556_p2, %p907_p3 }
 0x263   : > { %693 = dma.done.wait (!%p551_p4), %s447_s12, 128  }
 0x264   : > { %695 = vsyncadd (!%p551_p4), %s447_s12, 4294967168  ;;  %p15_p7 = scmp.ge.s32.totalorder %s772_s21, 4   ;;  %s908_s15 = smov %s702_s16 }
 0x265   : > { %s909_s16 = smov %s706_s17  ;;  %s910_s17 = smov %s783_s24 }
 0x266   : > { %s911_s18 = smov %s772_s21  ;;  %17 = sbr.rel (!%p15_p7) target bundleno = 4 (0x4), region = 79 }
 0x26d   :  { %452 = vsyncpa [#allocation3], 1 }
 0x26e   :  { %454 = vsyncpa [#allocation3 + $0x1], 1 }
 0x26f   :  { %455 = vsyncpa [#allocation4], 1 }
 0x270   :  { %457 = vsyncpa [#allocation4 + $0x1], 1 }

</bundles_post_ra>
